<compile_context>
chip_gen: v5e
topology: v5e:2x2
jax: 0.10.0
libtpu: 0.0.40
codegen_flags: <defaults>
</compile_context>

<pallas_src>
import functools

import jax
import jax.numpy as jnp
import numpy as np
from jax.experimental import pallas as pl
from jax.experimental.pallas import tpu as pltpu


def _round_up(x, m):
    return (x + m - 1) // m * m


def _batch_tiling(B, tb_max=512):
    """Pick (tile_rows, padded_batch_rows).

    - Tiles up to 512 rows amortize the ~0.35 us per-grid-step overhead.
    - Once the batch is large enough (>= 64 rows), use at least two tiles so
      dimension_semantics=("parallel",) can spread them over v7x's 2 TCs.
    - Tiny batches run as a single tile with minimal row padding.
    """
    bp8 = _round_up(max(B, 1), 8)
    if bp8 < 64:
        return bp8, bp8
    if bp8 <= 2 * tb_max:
        tb = _round_up((bp8 + 1) // 2, 8)
        return tb, 2 * tb
    return tb_max, _round_up(bp8, tb_max)


def pack_encoder_params(params, num_agent, action_size, compute_dtype=jnp.bfloat16):
    """One-time host-side repacking of fc / fc2 into per-activation-group,
    lane-padded weight blocks.  Call once at parameter-prep time."""
    w1 = np.asarray(params["w1"], np.float32)     # (2 + 3A + action, F)
    b1 = np.asarray(params["b1"], np.float32)
    w2 = np.asarray(params["w2"], np.float32)     # (F + 5 + (A+1)*16, F)
    b2 = np.asarray(params["b2"], np.float32)

    A = num_agent
    F = w1.shape[1]
    F8 = _round_up(F, 8)                          # padded output lane width
    hist_dim = (A + 1) * 16

    def pad_cols(rows):                           # (K, F) -> (K, F8), zero-padded lanes
        blk = np.zeros((rows.shape[0], F8), np.float32)
        blk[:, :F] = rows
        return jnp.asarray(blk, compute_dtype)

    # fc input rows in PyTorch feature order: [goal(2), (x, y, c)*A, action].
    x_rows = [2 + 3 * a for a in range(A)]
    y_rows = [3 + 3 * a for a in range(A)]
    c_rows = [4 + 3 * a for a in range(A)]
    act_rows = list(range(2 + 3 * A, 2 + 3 * A + action_size))

    # fc2 input rows: [h(F), r_pose(5), padded_hist(hist_dim)].
    w2_h = np.zeros((F8, F), np.float32)
    w2_h[:F] = w2[:F]                             # padded h lanes are zero anyway

    return {
        "w1_goal": pad_cols(w1[:2]),
        "w1_x": pad_cols(w1[x_rows]),
        "w1_y": pad_cols(w1[y_rows]),
        "w1_c": pad_cols(w1[c_rows]),
        "w1_act": pad_cols(w1[act_rows]),
        "b1": jnp.asarray(np.pad(b1, (0, F8 - F))[None, :], jnp.float32),
        "w2_h": pad_cols(w2_h),
        "w2_pose": pad_cols(w2[F:F + 5]),
        "w2_hist": pad_cols(w2[F + 5:F + 5 + hist_dim]),
        "b2": jnp.asarray(np.pad(b2, (0, F8 - F))[None, :], jnp.float32),
        "feature_size": F, "f8": F8, "num_agent": A,
        "action_size": action_size, "hist_dim": hist_dim,
        "compute_dtype": np.dtype(compute_dtype),
    }


def _encoder_kernel(goal_ref, ax_ref, ay_ref, action_ref, pose_ref, hist_ref,
                    w1g_ref, w1x_ref, w1y_ref, w1c_ref, w1a_ref, b1_ref,
                    w2h_ref, w2p_ref, w2t_ref, b2_ref,
                    out_ref, *, compute_dtype, mxu_precision):
    # ---- add_collision_probability (f32 on the VPU/EUP) ---------------------
    ax = ax_ref[...]                                   # (TB, A) f32
    ay = ay_ref[...]
    dist = jnp.sqrt(ax * ax + ay * ay)
    # 1 - sigmoid(z) == sigmoid(-z); zero-distance agents give col == 0.
    col = jnp.where(dist != 0.0, jax.nn.sigmoid((0.55 - dist) * 10.0), 0.0)

    def mm(x, w_ref):                                  # per-group partial dot
        return jnp.dot(x.astype(compute_dtype), w_ref[...],
                       preferred_element_type=jnp.float32,
                       precision=mxu_precision)

    # ---- h = relu(fc([goal, (x,y,c)*A, action])) ; dropout_fc = identity ----
    h = (mm(goal_ref[...], w1g_ref) + mm(ax, w1x_ref) + mm(ay, w1y_ref)
         + mm(col, w1c_ref) + mm(action_ref[...], w1a_ref))
    h = jnp.maximum(h + b1_ref[...], 0.0)              # (TB, F8) f32

    # ---- h = relu(fc2([h, r_pose, padded_hist])) ; dropout_fc2 = identity ---
    h2 = mm(h, w2h_ref) + mm(pose_ref[...], w2p_ref) + mm(hist_ref[...], w2t_ref)
    out_ref[...] = jnp.maximum(h2 + b2_ref[...], 0.0).astype(out_ref.dtype)


def custom_encoder_with_action(goal_robot_rel, agents_rel, action, r_pose,
                               padded_hist, packed):
    """Batch-tiled Pallas forward.  Activation pieces go in separately (no slab
    materialization); weight blocks are pinned via index_map=(0,0)."""
    B = goal_robot_rel.shape[0]
    F = packed["feature_size"]
    F8 = packed["f8"]
    A = packed["num_agent"]
    compute_dtype = packed["compute_dtype"]
    # Full-f32 packing -> exact MXU passes so the tight reference check holds;
    # bf16 packing -> native single-pass MXU (default precision).
    mxu_precision = (jax.lax.Precision.HIGHEST
                     if compute_dtype == np.dtype(np.float32) else None)

    TB, BP = _batch_tiling(B)

    acts = [goal_robot_rel.astype(jnp.float32),
            agents_rel[:, :, 0].astype(jnp.float32),
            agents_rel[:, :, 1].astype(jnp.float32),
            action.astype(jnp.float32),
            r_pose.astype(jnp.float32),
            padded_hist.astype(jnp.float32)]
    if BP != B:                                        # pad batch only when needed
        acts = [jnp.pad(a, ((0, BP - B), (0, 0))) for a in acts]

    weights = (packed["w1_goal"], packed["w1_x"], packed["w1_y"], packed["w1_c"],
               packed["w1_act"], packed["b1"],
               packed["w2_h"], packed["w2_pose"], packed["w2_hist"], packed["b2"])

    in_specs = [pl.BlockSpec((TB, a.shape[1]), lambda i: (i, 0)) for a in acts]
    # Grid-invariant index_map => weights stay VMEM-resident, DMA'd once.
    in_specs += [pl.BlockSpec(w.shape, lambda i: (0, 0)) for w in weights]
    out_spec = pl.BlockSpec((TB, F8), lambda i: (i, 0))

    flops_per_row = (2 * (2 + 3 * A + packed["action_size"]) * F8
                     + 2 * (F8 + 5 + packed["hist_dim"]) * F8)
    act_bytes = sum(int(np.prod(a.shape)) * a.dtype.itemsize for a in acts)
    w_bytes = sum(int(np.prod(w.shape)) * w.dtype.itemsize for w in weights)
    cost = pl.CostEstimate(flops=int(BP * flops_per_row),
                           transcendentals=int(BP * A),
                           bytes_accessed=int(act_bytes + w_bytes + BP * F8 * 4))

    out = pl.pallas_call(
        functools.partial(_encoder_kernel, compute_dtype=compute_dtype,
                          mxu_precision=mxu_precision),
        out_shape=jax.ShapeDtypeStruct((BP, F8), jnp.float32),
        grid=(BP // TB,),
        in_specs=in_specs,
        out_specs=out_spec,
        compiler_params=pltpu.CompilerParams(
            dimension_semantics=("parallel",)),
        cost_estimate=cost,
    )(*acts, *weights)

    return out[:B, :F]


def reference_forward(goal_robot_rel, agents_rel, action, r_pose, padded_hist, params):
    """Pure-JAX transcription of the PyTorch forward (eval mode) for verification."""
    B, A, _ = agents_rel.shape
    hp = jax.lax.Precision.HIGHEST
    ax, ay = agents_rel[:, :, 0], agents_rel[:, :, 1]
    dist = jnp.sqrt(ax ** 2 + ay ** 2)
    col = jnp.where(dist != 0.0, 1.0 - jax.nn.sigmoid((dist - 0.55) * 10.0), 0.0)
    sorted_rel = jnp.concatenate([agents_rel, col[:, :, None]], axis=2)   # (B, A, 3)
    feat1 = jnp.concatenate([goal_robot_rel, sorted_rel.reshape(B, A * 3), action], axis=-1)
    h = jax.nn.relu(jnp.dot(feat1, params["w1"], precision=hp) + params["b1"])
    feat2 = jnp.concatenate([h, r_pose, padded_hist], axis=-1)
    return jax.nn.relu(jnp.dot(feat2, params["w2"], precision=hp) + params["b2"])


def init_linear(key, fan_in, fan_out):
    """Deterministic PyTorch-style nn.Linear init, stored as (in, out)."""
    kw, kb = jax.random.split(key)
    bound = 1.0 / np.sqrt(fan_in)
    w = jax.random.uniform(kw, (fan_in, fan_out), jnp.float32, -bound, bound)
    b = jax.random.uniform(kb, (fan_out,), jnp.float32, -bound, bound)
    return w, b


if __name__ == "__main__":
    # Small shapes consistent with the module.
    B = 8                 # batch
    num_agent = 4
    action_size = 2
    feature_size = 32

    key = jax.random.PRNGKey(0)
    k_goal, k_ag, k_act, k_pose, k_hist, k_fc, k_fc2 = jax.random.split(key, 7)

    # Synthetic stand-ins for prepare_states / Hist_Encoder outputs.
    goal_robot_rel = jax.random.normal(k_goal, (B, 2), jnp.float32)
    agents_rel = jax.random.normal(k_ag, (B, num_agent, 2), jnp.float32)   # padded_cur_agents_obs[:, 1:]
    agents_rel = agents_rel.at[0, 0].set(0.0)        # exercise the dist == 0 guard
    action = jax.random.normal(k_act, (B, action_size), jnp.float32)
    r_pose = jax.random.normal(k_pose, (B, 5), jnp.float32)
    padded_hist = jax.random.normal(k_hist, (B, (num_agent + 1) * 16), jnp.float32)

    # fc : Linear(2 + num_agent*3 + action_size, feature_size)
    # fc2: Linear(feature_size + 5 + (num_agent+1)*16, feature_size)
    w1, b1 = init_linear(k_fc, 2 + num_agent * 3 + action_size, feature_size)
    w2, b2 = init_linear(k_fc2, feature_size + 5 + (num_agent + 1) * 16, feature_size)
    params = {"w1": w1, "b1": b1, "w2": w2, "b2": b2}

    ref = reference_forward(goal_robot_rel, agents_rel, action, r_pose,
                            padded_hist, params)

    # 1) f32 packing: tight bit-accuracy check of the kernel structure.
    packed_f32 = pack_encoder_params(params, num_agent, action_size,
                                     compute_dtype=jnp.float32)
    out_f32 = custom_encoder_with_action(goal_robot_rel, agents_rel, action,
                                         r_pose, padded_hist, packed_f32)
    out_f32 = jax.block_until_ready(out_f32)
    np.testing.assert_allclose(np.asarray(out_f32), np.asarray(ref),
                               rtol=1e-4, atol=1e-4)

    # 2) bf16 packing (production default for v6e/v7x): half the weight bytes,
    #    native MXU path; elementwise math and accumulation stay f32.
    packed_bf16 = pack_encoder_params(params, num_agent, action_size)
    out_bf16 = custom_encoder_with_action(goal_robot_rel, agents_rel, action,
                                          r_pose, padded_hist, packed_bf16)
    out_bf16 = jax.block_until_ready(out_bf16)
    np.testing.assert_allclose(np.asarray(out_bf16), np.asarray(ref),
                               rtol=1e-1, atol=5e-2)

    print("KERNEL_OK")
</pallas_src>

<mosaic_0001>
module attributes {stable_mosaic.version = 11 : i64} {
  func.func @_encoder_kernel(%arg0: i32, %arg1: memref<8x2xf32, #tpu.memory_space<vmem>>, %arg2: memref<8x4xf32, #tpu.memory_space<vmem>>, %arg3: memref<8x4xf32, #tpu.memory_space<vmem>>, %arg4: memref<8x2xf32, #tpu.memory_space<vmem>>, %arg5: memref<8x5xf32, #tpu.memory_space<vmem>>, %arg6: memref<8x80xf32, #tpu.memory_space<vmem>>, %arg7: memref<2x32xf32, #tpu.memory_space<vmem>>, %arg8: memref<4x32xf32, #tpu.memory_space<vmem>>, %arg9: memref<4x32xf32, #tpu.memory_space<vmem>>, %arg10: memref<4x32xf32, #tpu.memory_space<vmem>>, %arg11: memref<2x32xf32, #tpu.memory_space<vmem>>, %arg12: memref<1x32xf32, #tpu.memory_space<vmem>>, %arg13: memref<32x32xf32, #tpu.memory_space<vmem>>, %arg14: memref<5x32xf32, #tpu.memory_space<vmem>>, %arg15: memref<80x32xf32, #tpu.memory_space<vmem>>, %arg16: memref<1x32xf32, #tpu.memory_space<vmem>>, %arg17: memref<8x32xf32, #tpu.memory_space<vmem>>) attributes {dimension_semantics = [#tpu.dimension_semantics<parallel>], iteration_bounds = array<i64: 1>, scalar_prefetch = 0 : i64, scratch_operands = 0 : i64, tpu.core_type = #tpu.core_type<tc>, window_params = [{transform_indices = @transform_0, window_bounds = array<i64: 8, 2>}, {transform_indices = @transform_1, window_bounds = array<i64: 8, 4>}, {transform_indices = @transform_2, window_bounds = array<i64: 8, 4>}, {transform_indices = @transform_3, window_bounds = array<i64: 8, 2>}, {transform_indices = @transform_4, window_bounds = array<i64: 8, 5>}, {transform_indices = @transform_5, window_bounds = array<i64: 8, 80>}, {pipeline_mode = #tpu.pipeline_mode<synchronous>, transform_indices = @transform_6, window_bounds = array<i64: 2, 32>}, {pipeline_mode = #tpu.pipeline_mode<synchronous>, transform_indices = @transform_7, window_bounds = array<i64: 4, 32>}, {pipeline_mode = #tpu.pipeline_mode<synchronous>, transform_indices = @transform_8, window_bounds = array<i64: 4, 32>}, {pipeline_mode = #tpu.pipeline_mode<synchronous>, transform_indices = @transform_9, window_bounds = array<i64: 4, 32>}, {pipeline_mode = #tpu.pipeline_mode<synchronous>, transform_indices = @transform_10, window_bounds = array<i64: 2, 32>}, {pipeline_mode = #tpu.pipeline_mode<synchronous>, transform_indices = @transform_11, window_bounds = array<i64: 1, 32>}, {pipeline_mode = #tpu.pipeline_mode<synchronous>, transform_indices = @transform_12, window_bounds = array<i64: 32, 32>}, {pipeline_mode = #tpu.pipeline_mode<synchronous>, transform_indices = @transform_13, window_bounds = array<i64: 5, 32>}, {pipeline_mode = #tpu.pipeline_mode<synchronous>, transform_indices = @transform_14, window_bounds = array<i64: 80, 32>}, {pipeline_mode = #tpu.pipeline_mode<synchronous>, transform_indices = @transform_15, window_bounds = array<i64: 1, 32>}, {transform_indices = @transform_16, window_bounds = array<i64: 8, 32>}]} {
    %c0 = arith.constant 0 : index
    %c0_0 = arith.constant 0 : index
    %0 = vector.load %arg2[%c0, %c0_0] : memref<8x4xf32, #tpu.memory_space<vmem>>, vector<8x4xf32>
    %c0_1 = arith.constant 0 : index
    %c0_2 = arith.constant 0 : index
    %1 = vector.load %arg3[%c0_1, %c0_2] : memref<8x4xf32, #tpu.memory_space<vmem>>, vector<8x4xf32>
    %2 = arith.mulf %0, %0 : vector<8x4xf32>
    %3 = arith.mulf %1, %1 : vector<8x4xf32>
    %4 = arith.addf %2, %3 : vector<8x4xf32>
    %5 = math.sqrt %4 : vector<8x4xf32>
    %cst = arith.constant 0.000000e+00 : f32
    %6 = vector.broadcast %cst : f32 to vector<8x4xf32>
    %7 = arith.cmpf one, %5, %6 : vector<8x4xf32>
    %cst_3 = arith.constant 5.500000e-01 : f32
    %8 = vector.broadcast %cst_3 : f32 to vector<8x4xf32>
    %9 = arith.subf %8, %5 : vector<8x4xf32>
    %cst_4 = arith.constant 1.000000e+01 : f32
    %10 = vector.broadcast %cst_4 : f32 to vector<8x4xf32>
    %11 = arith.mulf %9, %10 : vector<8x4xf32>
    %12 = arith.negf %11 : vector<8x4xf32>
    %13 = math.exp %12 : vector<8x4xf32>
    %cst_5 = arith.constant 1.000000e+00 : f32
    %14 = vector.broadcast %cst_5 : f32 to vector<8x4xf32>
    %15 = arith.addf %14, %13 : vector<8x4xf32>
    %16 = arith.divf %14, %15 : vector<8x4xf32>
    %cst_6 = arith.constant 0.000000e+00 : f32
    %17 = vector.broadcast %cst_6 : f32 to vector<8x4xf32>
    %18 = arith.select %7, %16, %17 : vector<8x4xi1>, vector<8x4xf32>
    %c0_7 = arith.constant 0 : index
    %c0_8 = arith.constant 0 : index
    %19 = vector.load %arg1[%c0_7, %c0_8] : memref<8x2xf32, #tpu.memory_space<vmem>>, vector<8x2xf32>
    %c0_9 = arith.constant 0 : index
    %c0_10 = arith.constant 0 : index
    %20 = vector.load %arg7[%c0_9, %c0_10] : memref<2x32xf32, #tpu.memory_space<vmem>>, vector<2x32xf32>
    %cst_11 = arith.constant dense<0.000000e+00> : vector<8x32xf32>
    %21 = tpu.matmul %19, %20, %cst_11 {dimension_numbers = #tpu.dot_dimension_numbers<[1], [0], [0], [1], [0, 0, 1, 1], [], []>, precision = #tpu.contract_precision<fp32>} : vector<8x2xf32>, vector<2x32xf32>, vector<8x32xf32> -> vector<8x32xf32>
    %c0_12 = arith.constant 0 : index
    %c0_13 = arith.constant 0 : index
    %22 = vector.load %arg8[%c0_12, %c0_13] : memref<4x32xf32, #tpu.memory_space<vmem>>, vector<4x32xf32>
    %cst_14 = arith.constant dense<0.000000e+00> : vector<8x32xf32>
    %23 = tpu.matmul %0, %22, %cst_14 {dimension_numbers = #tpu.dot_dimension_numbers<[1], [0], [0], [1], [0, 0, 1, 1], [], []>, precision = #tpu.contract_precision<fp32>} : vector<8x4xf32>, vector<4x32xf32>, vector<8x32xf32> -> vector<8x32xf32>
    %24 = arith.addf %21, %23 : vector<8x32xf32>
    %c0_15 = arith.constant 0 : index
    %c0_16 = arith.constant 0 : index
    %25 = vector.load %arg9[%c0_15, %c0_16] : memref<4x32xf32, #tpu.memory_space<vmem>>, vector<4x32xf32>
    %cst_17 = arith.constant dense<0.000000e+00> : vector<8x32xf32>
    %26 = tpu.matmul %1, %25, %cst_17 {dimension_numbers = #tpu.dot_dimension_numbers<[1], [0], [0], [1], [0, 0, 1, 1], [], []>, precision = #tpu.contract_precision<fp32>} : vector<8x4xf32>, vector<4x32xf32>, vector<8x32xf32> -> vector<8x32xf32>
    %27 = arith.addf %24, %26 : vector<8x32xf32>
    %c0_18 = arith.constant 0 : index
    %c0_19 = arith.constant 0 : index
    %28 = vector.load %arg10[%c0_18, %c0_19] : memref<4x32xf32, #tpu.memory_space<vmem>>, vector<4x32xf32>
    %cst_20 = arith.constant dense<0.000000e+00> : vector<8x32xf32>
    %29 = tpu.matmul %18, %28, %cst_20 {dimension_numbers = #tpu.dot_dimension_numbers<[1], [0], [0], [1], [0, 0, 1, 1], [], []>, precision = #tpu.contract_precision<fp32>} : vector<8x4xf32>, vector<4x32xf32>, vector<8x32xf32> -> vector<8x32xf32>
    %30 = arith.addf %27, %29 : vector<8x32xf32>
    %c0_21 = arith.constant 0 : index
    %c0_22 = arith.constant 0 : index
    %31 = vector.load %arg4[%c0_21, %c0_22] : memref<8x2xf32, #tpu.memory_space<vmem>>, vector<8x2xf32>
    %c0_23 = arith.constant 0 : index
    %c0_24 = arith.constant 0 : index
    %32 = vector.load %arg11[%c0_23, %c0_24] : memref<2x32xf32, #tpu.memory_space<vmem>>, vector<2x32xf32>
    %cst_25 = arith.constant dense<0.000000e+00> : vector<8x32xf32>
    %33 = tpu.matmul %31, %32, %cst_25 {dimension_numbers = #tpu.dot_dimension_numbers<[1], [0], [0], [1], [0, 0, 1, 1], [], []>, precision = #tpu.contract_precision<fp32>} : vector<8x2xf32>, vector<2x32xf32>, vector<8x32xf32> -> vector<8x32xf32>
    %34 = arith.addf %30, %33 : vector<8x32xf32>
    %c0_26 = arith.constant 0 : index
    %c0_27 = arith.constant 0 : index
    %35 = vector.load %arg12[%c0_26, %c0_27] : memref<1x32xf32, #tpu.memory_space<vmem>>, vector<1x32xf32>
    %36 = vector.broadcast %35 : vector<1x32xf32> to vector<8x32xf32>
    %37 = arith.addf %34, %36 : vector<8x32xf32>
    %cst_28 = arith.constant 0.000000e+00 : f32
    %38 = vector.broadcast %cst_28 : f32 to vector<8x32xf32>
    %39 = arith.maximumf %37, %38 : vector<8x32xf32>
    %c0_29 = arith.constant 0 : index
    %c0_30 = arith.constant 0 : index
    %40 = vector.load %arg13[%c0_29, %c0_30] : memref<32x32xf32, #tpu.memory_space<vmem>>, vector<32x32xf32>
    %cst_31 = arith.constant dense<0.000000e+00> : vector<8x32xf32>
    %41 = tpu.matmul %39, %40, %cst_31 {dimension_numbers = #tpu.dot_dimension_numbers<[1], [0], [0], [1], [0, 0, 1, 1], [], []>, precision = #tpu.contract_precision<fp32>} : vector<8x32xf32>, vector<32x32xf32>, vector<8x32xf32> -> vector<8x32xf32>
    %c0_32 = arith.constant 0 : index
    %c0_33 = arith.constant 0 : index
    %42 = vector.load %arg5[%c0_32, %c0_33] : memref<8x5xf32, #tpu.memory_space<vmem>>, vector<8x5xf32>
    %c0_34 = arith.constant 0 : index
    %c0_35 = arith.constant 0 : index
    %43 = vector.load %arg14[%c0_34, %c0_35] : memref<5x32xf32, #tpu.memory_space<vmem>>, vector<5x32xf32>
    %cst_36 = arith.constant dense<0.000000e+00> : vector<8x32xf32>
    %44 = tpu.matmul %42, %43, %cst_36 {dimension_numbers = #tpu.dot_dimension_numbers<[1], [0], [0], [1], [0, 0, 1, 1], [], []>, precision = #tpu.contract_precision<fp32>} : vector<8x5xf32>, vector<5x32xf32>, vector<8x32xf32> -> vector<8x32xf32>
    %45 = arith.addf %41, %44 : vector<8x32xf32>
    %c0_37 = arith.constant 0 : index
    %c0_38 = arith.constant 0 : index
    %46 = vector.load %arg6[%c0_37, %c0_38] : memref<8x80xf32, #tpu.memory_space<vmem>>, vector<8x80xf32>
    %c0_39 = arith.constant 0 : index
    %c0_40 = arith.constant 0 : index
    %47 = vector.load %arg15[%c0_39, %c0_40] : memref<80x32xf32, #tpu.memory_space<vmem>>, vector<80x32xf32>
    %cst_41 = arith.constant dense<0.000000e+00> : vector<8x32xf32>
    %48 = tpu.matmul %46, %47, %cst_41 {dimension_numbers = #tpu.dot_dimension_numbers<[1], [0], [0], [1], [0, 0, 1, 1], [], []>, precision = #tpu.contract_precision<fp32>} : vector<8x80xf32>, vector<80x32xf32>, vector<8x32xf32> -> vector<8x32xf32>
    %49 = arith.addf %45, %48 : vector<8x32xf32>
    %c0_42 = arith.constant 0 : index
    %c0_43 = arith.constant 0 : index
    %50 = vector.load %arg16[%c0_42, %c0_43] : memref<1x32xf32, #tpu.memory_space<vmem>>, vector<1x32xf32>
    %51 = vector.broadcast %50 : vector<1x32xf32> to vector<8x32xf32>
    %52 = arith.addf %49, %51 : vector<8x32xf32>
    %cst_44 = arith.constant 0.000000e+00 : f32
    %53 = vector.broadcast %cst_44 : f32 to vector<8x32xf32>
    %54 = arith.maximumf %52, %53 : vector<8x32xf32>
    %c0_45 = arith.constant 0 : index
    %c0_46 = arith.constant 0 : index
    %55 = vector.load %arg17[%c0_45, %c0_46] : memref<8x32xf32, #tpu.memory_space<vmem>>, vector<8x32xf32>
    tpu.vector_store %arg17[%c0_45, %c0_46], %54 {strides = array<i32>} : memref<8x32xf32, #tpu.memory_space<vmem>>, vector<8x32xf32>,
    return
  }
  func.func @transform_0(%arg0: i32) -> (i32, i32) {
    %c0_i32 = arith.constant 0 : i32
    %c0_i32_0 = arith.constant 0 : i32
    return %arg0, %c0_i32 : i32, i32
  }
  func.func @transform_1(%arg0: i32) -> (i32, i32) {
    %c0_i32 = arith.constant 0 : i32
    %c0_i32_0 = arith.constant 0 : i32
    return %arg0, %c0_i32 : i32, i32
  }
  func.func @transform_2(%arg0: i32) -> (i32, i32) {
    %c0_i32 = arith.constant 0 : i32
    %c0_i32_0 = arith.constant 0 : i32
    return %arg0, %c0_i32 : i32, i32
  }
  func.func @transform_3(%arg0: i32) -> (i32, i32) {
    %c0_i32 = arith.constant 0 : i32
    %c0_i32_0 = arith.constant 0 : i32
    return %arg0, %c0_i32 : i32, i32
  }
  func.func @transform_4(%arg0: i32) -> (i32, i32) {
    %c0_i32 = arith.constant 0 : i32
    %c0_i32_0 = arith.constant 0 : i32
    return %arg0, %c0_i32 : i32, i32
  }
  func.func @transform_5(%arg0: i32) -> (i32, i32) {
    %c0_i32 = arith.constant 0 : i32
    %c0_i32_0 = arith.constant 0 : i32
    return %arg0, %c0_i32 : i32, i32
  }
  func.func @transform_6(%arg0: i32) -> (i32, i32) {
    %c0_i32 = arith.constant 0 : i32
    %c0_i32_0 = arith.constant 0 : i32
    %c0_i32_1 = arith.constant 0 : i32
    return %c0_i32, %c0_i32_0 : i32, i32
  }
  func.func @transform_7(%arg0: i32) -> (i32, i32) {
    %c0_i32 = arith.constant 0 : i32
    %c0_i32_0 = arith.constant 0 : i32
    %c0_i32_1 = arith.constant 0 : i32
    return %c0_i32, %c0_i32_0 : i32, i32
  }
  func.func @transform_8(%arg0: i32) -> (i32, i32) {
    %c0_i32 = arith.constant 0 : i32
    %c0_i32_0 = arith.constant 0 : i32
    %c0_i32_1 = arith.constant 0 : i32
    return %c0_i32, %c0_i32_0 : i32, i32
  }
  func.func @transform_9(%arg0: i32) -> (i32, i32) {
    %c0_i32 = arith.constant 0 : i32
    %c0_i32_0 = arith.constant 0 : i32
    %c0_i32_1 = arith.constant 0 : i32
    return %c0_i32, %c0_i32_0 : i32, i32
  }
  func.func @transform_10(%arg0: i32) -> (i32, i32) {
    %c0_i32 = arith.constant 0 : i32
    %c0_i32_0 = arith.constant 0 : i32
    %c0_i32_1 = arith.constant 0 : i32
    return %c0_i32, %c0_i32_0 : i32, i32
  }
  func.func @transform_11(%arg0: i32) -> (i32, i32) {
    %c0_i32 = arith.constant 0 : i32
    %c0_i32_0 = arith.constant 0 : i32
    %c0_i32_1 = arith.constant 0 : i32
    return %c0_i32, %c0_i32_0 : i32, i32
  }
  func.func @transform_12(%arg0: i32) -> (i32, i32) {
    %c0_i32 = arith.constant 0 : i32
    %c0_i32_0 = arith.constant 0 : i32
    %c0_i32_1 = arith.constant 0 : i32
    return %c0_i32, %c0_i32_0 : i32, i32
  }
  func.func @transform_13(%arg0: i32) -> (i32, i32) {
    %c0_i32 = arith.constant 0 : i32
    %c0_i32_0 = arith.constant 0 : i32
    %c0_i32_1 = arith.constant 0 : i32
    return %c0_i32, %c0_i32_0 : i32, i32
  }
  func.func @transform_14(%arg0: i32) -> (i32, i32) {
    %c0_i32 = arith.constant 0 : i32
    %c0_i32_0 = arith.constant 0 : i32
    %c0_i32_1 = arith.constant 0 : i32
    return %c0_i32, %c0_i32_0 : i32, i32
  }
  func.func @transform_15(%arg0: i32) -> (i32, i32) {
    %c0_i32 = arith.constant 0 : i32
    %c0_i32_0 = arith.constant 0 : i32
    %c0_i32_1 = arith.constant 0 : i32
    return %c0_i32, %c0_i32_0 : i32, i32
  }
  func.func @transform_16(%arg0: i32) -> (i32, i32) {
    %c0_i32 = arith.constant 0 : i32
    %c0_i32_0 = arith.constant 0 : i32
    return %arg0, %c0_i32 : i32, i32
  }
}

</mosaic_0001>

<bundles_post_ra>
// kernel: tpu_custom_call.1
= control target key start
LH: loop header
LB: loop body
LE: loop exit
PB: predicated region body
PF: predicated region fallthrough
CT: control target
= control target key end

     0   :  { %s2009_s0 = inlined_call_operand.vmem [shape: f32[8,2], index: 0, kind: input, shape index: {}]   ;;  %s2010_s1 = inlined_call_operand.vmem [shape: f32[8,4], index: 1, kind: input, shape index: {}]   ;;  %s2011_s2 = inlined_call_operand.vmem [shape: f32[8,4], index: 2, kind: input, shape index: {}]   ;;  %s2012_s3 = inlined_call_operand.vmem [shape: f32[8,2], index: 3, kind: input, shape index: {}]   ;;  %s2013_s4 = inlined_call_operand.vmem [shape: f32[8,5], index: 4, kind: input, shape index: {}]   ;;  %s2014_s5 = inlined_call_operand.vmem [shape: f32[8,80], index: 5, kind: input, shape index: {}]   ;;  %s2015_s6 = inlined_call_operand.vmem [shape: f32[2,32], index: 6, kind: input, shape index: {}]   ;;  %s2016_s7 = inlined_call_operand.vmem [shape: f32[4,32], index: 7, kind: input, shape index: {}]   ;;  %s2017_s8 = inlined_call_operand.vmem [shape: f32[4,32], index: 8, kind: input, shape index: {}]   ;;  %s2018_s9 = inlined_call_operand.vmem [shape: f32[4,32], index: 9, kind: input, shape index: {}]   ;;  %s2019_s10 = inlined_call_operand.vmem [shape: f32[2,32], index: 10, kind: input, shape index: {}]   ;;  %s2020_s11 = inlined_call_operand.vmem [shape: f32[1,32], index: 11, kind: input, shape index: {}]   ;;  %s2021_s12 = inlined_call_operand.vmem [shape: f32[32,32], index: 12, kind: input, shape index: {}]   ;;  %s2022_s13 = inlined_call_operand.vmem [shape: f32[5,32], index: 13, kind: input, shape index: {}]   ;;  %s2023_s14 = inlined_call_operand.vmem [shape: f32[80,32], index: 14, kind: input, shape index: {}]   ;;  %s2024_s15 = inlined_call_operand.vmem [shape: f32[1,32], index: 15, kind: input, shape index: {}]   ;;  %s2025_s16 = inlined_call_operand.hbm [shape: f32[8,32], index: 16, kind: output, shape index: {}]  }
   0x1   :  { %2026 = sst [smem:[#allocation5_spill]] %s2009_s0 }
   0x2   :  { %v96_v0 = vld [vmem:[%s2016_s7] sm:$0xf]  ;;  %vm101_vm0 = vcmask 1043456   ;;  %vm97_vm1 = vcmask 31744   ;;  %vm255_vm2 = vcmask 1041408   ;;  %s2027_s29 = sld [smem:[#allocation5_spill]] }
   0x3   :  { %v54_v1 = vld [vmem:[%s2010_s1] sm:$0xff]  ;;  %v103_v2 = vsel %vm101_vm0, %v96_v0, 0  ;;  %vm251_vm3 = vcmask 15360  }
   0x4   :  { %v56_v3 = vmul.f32 %v54_v1, %v54_v1  ;;  %v99_v4 = vsel %vm97_vm1, %v54_v1, 0  ;;  %v95_v5 = vld [vmem:[%s2015_s6] sm:$0x3]  ;;  %v120_v7 = vand.u32 4294901760, %v103_v2 }
   0x5   :  { %v1661_v8 = vand.u32 4294901760, %v99_v4  ;;  %v257_v9 = vsel %vm255_vm2, %v95_v5, 0  ;;  %v55_v13 = vld [vmem:[%s2011_s2] sm:$0xff] }
   0x6   :  { %v274_v11 = vand.u32 4294901760, %v257_v9  ;;  %121 = vmatpush.msra.mxu0 %v120_v7  ;;  %v147_v15 = vsub.f32 %v103_v2, %v120_v7  ;;  %v405_v16 = vld [vmem:[%s2017_s8] sm:$0xf]  ;;  %v57_v17 = vmul.f32 %v55_v13, %v55_v13 }
   0x7   :  { %v123_v14 = vsub.f32 %v99_v4, %v1661_v8 }
   0x8   :  { %v94_v6 = vld [vmem:[%s2027_s29] sm:$0xff] }
   0x9   :  { %v253_v10 = vsel %vm251_vm3, %v94_v6, 0 }
   0xa   :  { %v276_v12 = vand.u32 4294901760, %v253_v10 }
   0xb   :  { %21 = vsyncpa [#allocation3], 0  ;;  %275 = vmatpush.msra.mxu2 %v274_v11  ;;  %v301_v19 = vsub.f32 %v257_v9, %v274_v11  ;;  %v124_v20 = vand.u32 4294901760, %v123_v14  ;;  %v148_v21 = vand.u32 4294901760, %v147_v15  ;;  %174 = vmatpush.msrb.mxu0 %v147_v15  ;;  %v58_v22 = vadd.f32 %v57_v17, %v56_v3  ;;  %v559_v42 = vld [vmem:[%s2018_s9] sm:$0xf] }
   0xc   :  { %v1672_v18 = vsub.f32 %v253_v10, %v276_v12  ;;  %v410_v25 = vsel %vm101_vm0, %v405_v16, 0  ;;  %v407_v40 = vsel %vm97_vm1, %v55_v13, 0  ;;  %v564_v46 = vsel %vm101_vm0, %v559_v42, 0  ;;  %v714_v3 = vld [vmem:[%s2019_s10] sm:$0x3]  ;;  %s1561_s24 = smov [#allocation2]  }
   0xd   :  { %v302_v24 = vand.u32 4294901760, %v301_v19  ;;  %v125_v26 = vsub.f32 %v123_v14, %v124_v20  ;;  %v149_v27 = vsub.f32 %v147_v15, %v148_v21  ;;  %1529 = vrsqrt.f32 %v58_v22  ;;  %v713_v6 = vld [vmem:[%s2012_s3] sm:$0xff]  ;;  %s1514_s25 = sshll.u32 %s1561_s24, 4  ;;  %s1516_s28 = sshll.u32 %s2025_s16, 4  ;;  %s1515_s25 = int_to_ptr.vmem [resolvable:$true] %s1514_s25  ;;  %s1517_s28 = int_to_ptr.hbm [resolvable:$true] %s1516_s28 }
   0xe   :  { %v278_v23 = vand.u32 4294901760, %v1672_v18  ;;  %v1679_v32 = vand.u32 4294901760, %v410_v25  ;;  %v429_v44 = vand.u32 4294901760, %v407_v40  ;;  %v581_v47 = vand.u32 4294901760, %v564_v46 }
   0xf   :  { %v303_v29 = vsub.f32 %v301_v19, %v302_v24  ;;  %377 = vmatpush.msrb.mxu2 %v302_v24  ;;  %v126_v30 = vand.u32 4294901760, %v125_v26  ;;  %v150_v31 = vand.u32 4294901760, %v149_v27  ;;  %vm66_vm4 = vcmp.eq.f32.partialorder %v58_v22, inf }
  0x10   :  { %v279_v28 = vsub.f32 %v1672_v18, %v278_v23  ;;  %v454_v36 = vsub.f32 %v410_v25, %v1679_v32  ;;  %v69_v49 = vand.u32 2147483648, %v58_v22  ;;  %v608_v50 = vsub.f32 %v564_v46, %v581_v47 }
  0x11   :  { %v304_v34 = vand.u32 4294901760, %v303_v29  ;;  %127 = vmatmul.f32.vlgmr.msra.gmra.mxu0 %v126_v30  ;;  %151 = vmatpush.msra.mxu1 %v150_v31  ;;  %vm68_vm5 = vcmp.eq.f32.partialorder %v58_v22, 0.0  ;;  %v430_v52 = vsub.f32 %v407_v40, %v429_v44  ;;  %v719_v4 = vsel %vm255_vm2, %v714_v3, 0  ;;  %v878_v40 = vld [vmem:[%s2013_s4] sm:$0xff]  ;;  %v875_v3 = vld [vmem:[%s2021_s12 + $0x8] sm:$0xff] }
  0x12   :  { %v280_v33 = vand.u32 4294901760, %v279_v28  ;;  %153 = vmatmul.f32.vlgmr.msra.gmra.mxu1 %v1661_v8  ;;  %223 = vmatpush.msra.mxu0 %v148_v21  ;;  %v455_v39 = vand.u32 4294901760, %v454_v36  ;;  %v609_v54 = vand.u32 4294901760, %v608_v50  ;;  %v736_v5 = vand.u32 4294901760, %v719_v4 }
  0x13   :  { %v1530_v35 = vpop.eup %1529  ;;  %197 = vmatpush.msrb.mxu1 %v120_v7  ;;  %305 = vmatpush.msra.mxu3 %v304_v34  ;;  %v431_v59 = vand.u32 4294901760, %v430_v52  ;;  %vm880_vm11 = vcmask 39936   ;;  %vm884_vm12 = vcmask 1044480   ;;  %vm1234_vm13 = vcmask 654336  }
  0x14   :  { %281 = vmatmul.f32.vlgmr.msra.gmra.mxu2 %v280_v33  ;;  %v60_v37 = vmul.f32 %v1530_v35, %v58_v22  ;;  %307 = vmatmul.f32.vlgmr.msra.gmra.mxu3 %v276_v12  ;;  %v456_v45 = vsub.f32 %v454_v36, %v455_v39  ;;  %v610_v57 = vsub.f32 %v608_v50, %v609_v54  ;;  %v882_v42 = vsel %vm880_vm11, %v878_v40, 0 }
  0x15   :  { %245 = vmatpush.msra.mxu1 %v120_v7  ;;  %481 = vmatpush.msra.mxu2 %v454_v36  ;;  %v432_v63 = vsub.f32 %v430_v52, %v431_v59  ;;  %vm1034_vm14 = vcmask 261120  }
  0x16   :  { %399 = vmatpush.msrb.mxu3 %v274_v11  ;;  %v61_v38 = vmul.f32 %v1530_v35, %v60_v37  ;;  %v457_v53 = vand.u32 4294901760, %v456_v45  ;;  %v611_v60 = vand.u32 4294901760, %v610_v57 }
  0x17   :  { %v433_v0 = vand.u32 4294901760, %v432_v63 }
  0x18   :  { %504 = vmatpush.msra.mxu3 %v1679_v32  ;;  %v62_v41 = vmul.f32 0.5, %v61_v38 }
  0x19   :  { %177 = vmatmul.f32.vlgmr.msrb.gmra.mxu0 %v123_v14 }
  0x1a   :  { %201 = vmatmul.f32.vlgmr.msrb.gmra.mxu1 %v124_v20  ;;  %v63_v43 = vsub.f32 1.5, %v62_v41  ;;  %328 = vmatpush.msrb.mxu0 %v301_v19  ;;  %v879_v41 = vld [vmem:[%s2022_s13] sm:$0x1f] }
  0x1b   :  { %351 = vmatpush.msrb.mxu1 %v274_v11 }
  0x1c   :  { %379 = vmatmul.f32.vlgmr.msrb.gmra.mxu2 %v276_v12  ;;  %v64_v48 = vmul.f32 %v1530_v35, %v63_v43  ;;  %401 = vmatmul.f32.vlgmr.msrb.gmra.mxu3 %v276_v12  ;;  %v716_v12 = vsel %vm251_vm3, %v713_v6, 0  ;;  %v886_v43 = vsel %vm884_vm12, %v879_v41, 0 }
  0x1d   :  { %582 = vmatpush.msrb.mxu2 %v581_v47  ;;  %612 = vmatpush.msrb.mxu3 %v611_v60  ;;  %v738_v17 = vand.u32 4294901760, %v716_v12  ;;  %v903_v46 = vand.u32 4294901760, %v886_v43 }
  0x1e   :  { %v65_v51 = vmul.f32 %v64_v48, %v58_v22 }
  0x20   :  { %v67_v55 = vsel %vm66_vm4, %v58_v22, %v65_v51  ;;  %v739_v22 = vsub.f32 %v716_v12, %v738_v17 }
  0x21   :  { %225 = vmatmul.f32.vlgmr.msra.gmra.mxu0 %v1661_v8  ;;  %v70_v56 = vsel %vm68_vm5, %v69_v49, %v67_v55 }
  0x22   :  { %247 = vmatmul.f32.vlgmr.msra.gmra.mxu1 %v1661_v8  ;;  %v72_v58 = vsub.f32 0.55, %v70_v56  ;;  %428 = vmatpush.msra.mxu0 %v1679_v32  ;;  %v763_v8 = vsub.f32 %v719_v4, %v736_v5  ;;  %vm71_vm10 = vcmp.ne.f32.partialorder %v70_v56, 0.0  ;;  %v740_v27 = vand.u32 4294901760, %v739_v22 }
  0x23   :  { %458 = vmatpush.msra.mxu1 %v457_v53 }
  0x24   :  { %484 = vmatmul.f32.vlgmr.msra.gmra.mxu2 %v430_v52  ;;  %v1525_v61 = vmul.f32 -10.0, %v72_v58  ;;  %508 = vmatmul.f32.vlgmr.msra.gmra.mxu3 %v431_v59  ;;  %v764_v11 = vand.u32 4294901760, %v763_v8  ;;  %v741_v30 = vsub.f32 %v739_v22, %v740_v27  ;;  %v877_v58 = vld [vmem:[%s2021_s12 + $0x18] sm:$0xff] }
  0x25   :  { %684 = vmatpush.msra.mxu2 %v609_v54  ;;  %706 = vmatpush.msra.mxu3 %v581_v47  ;;  %v1729_v60 = vand.u32 4294901760, %v877_v58 }
  0x26   :  { %v75_v62 = vmul.f32 1.442695, %v1525_v61  ;;  %v765_v15 = vsub.f32 %v763_v8, %v764_v11  ;;  %v742_v33 = vand.u32 4294901760, %v741_v30  ;;  %v876_v61 = vld [vmem:[%s2021_s12 + $0x10] sm:$0xff] }
  0x28   :  { %1531 = vpow2.f32 %v75_v62  ;;  %v766_v19 = vand.u32 4294901760, %v765_v15 }
  0x29   :  { %331 = vmatmul.f32.vlgmr.msrb.gmra.mxu0 %v1672_v18 }
  0x2a   :  { %355 = vmatmul.f32.vlgmr.msrb.gmra.mxu1 %v278_v23  ;;  %530 = vmatpush.msrb.mxu0 %v455_v39 }
  0x2b   :  { %552 = vmatpush.msrb.mxu1 %v1679_v32 }
  0x2e   :  { %v1532_v1 = vpop.eup %1531 }
  0x2f   :  { %v77_v2 = vadd.f32 1.0, %v1532_v1  ;;  %v1739_v1 = vand.u32 4294901760, %v876_v61 }
  0x31   :  { %434 = vmatmul.f32.vlgmr.msra.gmra.mxu0 %v433_v0  ;;  %1533 = vrcp.f32 %v77_v2  ;;  %v89_v10 = vand.u32 2147483648, %v77_v2  ;;  %vm83_vm6 = vweird.f32 %v77_v2  ;;  %v87_v14 = vand.u32 2147483647, %v77_v2 }
  0x32   :  { %460 = vmatmul.f32.vlgmr.msra.gmra.mxu1 %v429_v44  ;;  %635 = vmatpush.msra.mxu0 %v608_v50  ;;  %v930_v50 = vsub.f32 %v886_v43, %v903_v46  ;;  %v1737_v0 = vsub.f32 %v877_v58, %v1729_v60 }
  0x33   :  { %658 = vmatpush.msra.mxu1 %v581_v47  ;;  %v90_v18 = vor.u32 1.1754944e-38, %v89_v10  ;;  %vm88_vm9 = vcmp.eq.f32.partialorder %v87_v14, 8.507059e+37  ;;  %v874_v10 = vld [vmem:[%s2021_s12] sm:$0xff] }
  0x34   :  { %v931_v53 = vand.u32 4294901760, %v930_v50 }
  0x36   :  { %v932_v56 = vsub.f32 %v930_v50, %v931_v53 }
  0x37   :  { %v1534_v7 = vpop.eup %1533 }
  0x38   :  { %v79_v9 = vmul.f32 %v1534_v7, %v77_v2  ;;  %vm84_vm7 = vweird.f32 %v1534_v7  ;;  %v933_v59 = vand.u32 4294901760, %v932_v56  ;;  %v1233_v2 = vld [vmem:[%s2023_s14 + $0x48] sm:$0xff] }
  0x39   :  { %532 = vmatmul.f32.vlgmr.msrb.gmra.mxu0 %v429_v44  ;;  %vm85_vm8 = vmor %vm83_vm6, %vm84_vm7  ;;  %v1749_v4 = vand.u32 4294901760, %v1233_v2 }
  0x3a   :  { %554 = vmatmul.f32.vlgmr.msrb.gmra.mxu1 %v429_v44  ;;  %v80_v13 = vsub.f32 1.0, %v79_v9  ;;  %737 = vmatpush.msrb.mxu0 %v736_v5  ;;  %v1715_v44 = vand.u32 4294901760, %v882_v42  ;;  %v1232_v9 = vld [vmem:[%s2023_s14 + $0x40] sm:$0xff] }
  0x3b   :  { %767 = vmatpush.msrb.mxu1 %v766_v19  ;;  %v1771_v12 = vand.u32 4294901760, %v1232_v9 }
  0x3c   :  { %v81_v16 = vmul.f32 %v1534_v7, %v80_v13  ;;  %v906_v47 = vsub.f32 %v882_v42, %v1715_v44 }
  0x3e   :  { %v82_v20 = vadd.f32 %v1534_v7, %v81_v16  ;;  %v907_v51 = vand.u32 4294901760, %v906_v47  ;;  %v1780_v16 = vand.u32 4294901760, %v874_v10 }
  0x40   :  { %v86_v21 = vsel %vm85_vm8, %v1534_v7, %v82_v20  ;;  %v908_v54 = vsub.f32 %v906_v47, %v907_v51  ;;  %v1757_v7 = vsub.f32 %v876_v61, %v1739_v1  ;;  %v1790_v20 = vsub.f32 %v1232_v9, %v1771_v12 }
  0x41   :  { %v91_v23 = vsel %vm88_vm9, %v90_v18, %v86_v21  ;;  %v1795_v21 = vsub.f32 %v874_v10, %v1780_v16 }
  0x42   :  { %v93_v24 = vsel %vm71_vm10, %v91_v23, 0.0  ;;  %v909_v57 = vand.u32 4294901760, %v908_v54  ;;  %v1087_v41 = vand.u32 4294901760, %v1757_v7 }
  0x43   :  { %v561_v25 = vsel %vm97_vm1, %v93_v24, 0  ;;  %v1287_v24 = vand.u32 4294901760, %v1790_v20 }
  0x44   :  { %v583_v26 = vand.u32 4294901760, %v561_v25  ;;  %v1088_v54 = vsub.f32 %v1757_v7, %v1087_v41 }
  0x45   :  { %v1288_v30 = vsub.f32 %v1790_v20, %v1287_v24 }
  0x46   :  { %v584_v28 = vsub.f32 %v561_v25, %v583_v26  ;;  %614 = vmatmul.f32.vlgmr.msrb.gmra.mxu3 %v583_v26 }
  0x47   :  { %813 = vmatpush.msrb.mxu3 %v736_v5 }
  0x48   :  { %v585_v29 = vand.u32 4294901760, %v584_v28  ;;  %638 = vmatmul.f32.vlgmr.msra.gmra.mxu0 %v584_v28 }
  0x49   :  { %839 = vmatpush.msra.mxu0 %v764_v11  ;;  %v1769_v11 = vsub.f32 %v1233_v2, %v1749_v4 }
  0x4a   :  { %v586_v31 = vsub.f32 %v584_v28, %v585_v29  ;;  %662 = vmatmul.f32.vlgmr.msra.gmra.mxu1 %v585_v29  ;;  %v1229_v28 = vld [vmem:[%s2023_s14 + $0x28] sm:$0xff] }
  0x4b   :  { %861 = vmatpush.msra.mxu1 %v736_v5  ;;  %v1281_v18 = vand.u32 4294901760, %v1769_v11 }
  0x4c   :  { %v587_v32 = vand.u32 4294901760, %v586_v31  ;;  %v1081_v31 = vand.u32 4294901760, %v1737_v0 }
  0x4d   :  { %v1282_v23 = vsub.f32 %v1769_v11, %v1281_v18 }
  0x4e   :  { %588 = vmatmul.f32.vlgmr.msrb.gmra.mxu2 %v587_v32  ;;  %708 = vmatmul.f32.vlgmr.msra.gmra.mxu3 %v583_v26 }
  0x4f   :  { %790 = vmatpush.msrb.mxu2 %v763_v8  ;;  %934 = vmatpush.msra.mxu3 %v933_v59  ;;  %v1759_v8 = vand.u32 4294901760, %v875_v3  ;;  %v1283_v29 = vand.u32 4294901760, %v1282_v23 }
  0x50   :  { %743 = vmatmul.f32.vlgmr.msrb.gmra.mxu0 %v742_v33 }
  0x51   :  { %957 = vmatpush.msrb.mxu0 %v930_v50  ;;  %v1778_v15 = vsub.f32 %v875_v3, %v1759_v8  ;;  %v1099_v3 = vand.u32 4294901760, %v1795_v21 }
  0x52   :  { %769 = vmatmul.f32.vlgmr.msrb.gmra.mxu1 %v738_v17 }
  0x53   :  { %980 = vmatpush.msrb.mxu1 %v903_v46  ;;  %v1100_v23 = vsub.f32 %v1795_v21, %v1099_v3 }
  0x56   :  { %686 = vmatmul.f32.vlgmr.msra.gmra.mxu2 %v583_v26  ;;  %817 = vmatmul.f32.vlgmr.msrb.gmra.mxu3 %v740_v27 }
  0x57   :  { %904 = vmatpush.msra.mxu2 %v903_v46  ;;  %1028 = vmatpush.msrb.mxu3 %v903_v46 }
  0x58   :  { %841 = vmatmul.f32.vlgmr.msra.gmra.mxu0 %v738_v17 }
  0x59   :  { %1051 = vmatpush.msra.mxu0 %v1729_v60 }
  0x5a   :  { %863 = vmatmul.f32.vlgmr.msra.gmra.mxu1 %v738_v17  ;;  %v1231_v17 = vld [vmem:[%s2023_s14 + $0x38] sm:$0xff] }
  0x5b   :  { %1053 = vmatpush.msra.mxu0 %v1739_v1  ;;  %v1787_v19 = vand.u32 4294901760, %v1231_v17 }
  0x5d   :  { %1055 = vmatpush.msra.mxu0 %v1759_v8  ;;  %v1809_v26 = vsub.f32 %v1231_v17, %v1787_v19 }
  0x5e   :  { %793 = vmatmul.f32.vlgmr.msrb.gmra.mxu2 %v739_v22  ;;  %936 = vmatmul.f32.vlgmr.msra.gmra.mxu3 %v1715_v44  ;;  %v1230_v22 = vld [vmem:[%s2023_s14 + $0x30] sm:$0xff] }
  0x5f   :  { %1006 = vmatpush.msrb.mxu2 %v931_v53  ;;  %1151 = vmatpush.msra.mxu3 %v1729_v60  ;;  %v1806_v25 = vand.u32 4294901760, %v1230_v22  ;;  %v1293_v32 = vand.u32 4294901760, %v1809_v26 }
  0x60   :  { %960 = vmatmul.f32.vlgmr.msrb.gmra.mxu0 %v906_v47 }
  0x61   :  { %1153 = vmatpush.msra.mxu3 %v1739_v1  ;;  %1057 = vmatpush.msra.mxu0 %v1780_v16  ;;  %v1294_v40 = vsub.f32 %v1809_v26, %v1293_v32 }
  0x62   :  { %984 = vmatmul.f32.vlgmr.msrb.gmra.mxu1 %v907_v51  ;;  %v1227_v51 = vld [vmem:[%s2023_s14 + $0x18] sm:$0xff] }
  0x63   :  { %1155 = vmatpush.msra.mxu3 %v1759_v8  ;;  %1180 = vmatpush.msrb.mxu0 %v1081_v31  ;;  %v1295_v53 = vand.u32 4294901760, %v1294_v40  ;;  %v1864_v59 = vand.u32 4294901760, %v1227_v51 }
  0x65   :  { %1157 = vmatpush.msra.mxu3 %v1780_v16  ;;  %1184 = vmatpush.msrb.mxu0 %v1087_v41  ;;  %v1882_v17 = vsub.f32 %v1227_v51, %v1864_v59 }
  0x66   :  { %910 = vmatmul.f32.vlgmr.msra.gmra.mxu2 %v909_v57  ;;  %1030 = vmatmul.f32.vlgmr.msrb.gmra.mxu3 %v1715_v44 }
  0x67   :  { %1122 = vmatpush.msra.mxu2 %v1737_v0  ;;  %1284 = vmatpush.msrb.mxu3 %v1283_v29 }
  0x69   :  { %1125 = vmatpush.msra.mxu2 %v1757_v7 }
  0x6b   :  { %1128 = vmatpush.msra.mxu2 %v1778_v15 }
  0x6d   :  { %1131 = vmatpush.msra.mxu2 %v1795_v21 }
  0x6e   :  { %1008 = vmatmul.f32.vlgmr.msrb.gmra.mxu2 %v1715_v44 }
  0x6f   :  { %1245 = vmatpush.msrb.mxu2 %v1749_v4 }
  0x71   :  { %1247 = vmatpush.msrb.mxu2 %v1771_v12 }
  0x73   :  { %1249 = vmatpush.msrb.mxu2 %v1787_v19 }
  0x75   :  { %1251 = vmatpush.msrb.mxu2 %v1806_v25 }
  0x8e   :  { %v128_v34 = vpop.f32.mrf.mxu0 }
  0x8f   :  { %v154_v35 = vpop.f32.mrf.mxu1 }
  0x90   :  { %v155_v55 = vadd.f32 %v154_v35, %v128_v34  ;;  %v1827_v34 = vand.u32 4294901760, %v1229_v28  ;;  %v1830_v35 = vsub.f32 %v1230_v22, %v1806_v25  ;;  %v1225_v22 = vld [vmem:[%s2023_s14 + $0x8] sm:$0xff] }
  0x92   :  { %v1299_v46 = vand.u32 4294901760, %v1830_v35  ;;  %v1850_v50 = vsub.f32 %v1229_v28, %v1827_v34  ;;  %1253 = vmatpush.msrb.mxu2 %v1827_v34 }
  0x94   :  { %v1300_v57 = vsub.f32 %v1830_v35, %v1299_v46  ;;  %v1305_v58 = vand.u32 4294901760, %v1850_v50 }
  0x96   :  { %v178_v36 = vpop.f32.mrf.mxu0  ;;  %v1301_v9 = vand.u32 4294901760, %v1300_v57  ;;  %v1306_v10 = vsub.f32 %v1850_v50, %v1305_v58 }
  0x97   :  { %v202_v37 = vpop.f32.mrf.mxu1  ;;  %v1717_v45 = vpop.f32.mrf.mxu3  ;;  %v179_v62 = vadd.f32 %v178_v36, %v155_v55  ;;  %v1228_v36 = vld [vmem:[%s2023_s14 + $0x20] sm:$0xff]  ;;  %v1093_v55 = vand.u32 4294901760, %v1778_v15 }
  0x98   :  { %v1720_v48 = vpop.f32.mrf.mxu2  ;;  %v1847_v47 = vand.u32 4294901760, %v1228_v36  ;;  %v1307_v29 = vand.u32 4294901760, %v1306_v10 }
  0x99   :  { %v203_v13 = vadd.f32 %v202_v37, %v179_v62  ;;  %v1289_v37 = vand.u32 4294901760, %v1288_v30  ;;  %v1226_v62 = vld [vmem:[%s2023_s14 + $0x10] sm:$0xff]  ;;  %v1094_v2 = vsub.f32 %v1778_v15, %v1093_v55  ;;  %1188 = vmatpush.msrb.mxu0 %v1093_v55 }
  0x9a   :  { %v1867_v61 = vsub.f32 %v1228_v36, %v1847_v47  ;;  %v1875_v7 = vand.u32 4294901760, %v1226_v62  ;;  %1255 = vmatpush.msrb.mxu2 %v1847_v47 }
  0x9b   :  { %1290 = vmatpush.msrb.mxu3 %v1289_v37  ;;  %v1095_v15 = vand.u32 4294901760, %v1094_v2  ;;  %v1224_v37 = vld [vmem:[%s2023_s14] sm:$0xff]  ;;  %1192 = vmatpush.msrb.mxu0 %v1099_v3 }
  0x9c   :  { %v1896_v36 = vsub.f32 %v1226_v62, %v1875_v7  ;;  %v1903_v40 = vand.u32 4294901760, %v1224_v37  ;;  %1257 = vmatpush.msrb.mxu2 %v1864_v59 }
  0x9d   :  { %1296 = vmatpush.msrb.mxu3 %v1295_v53 }
  0x9e   :  { %v1705_v38 = vpop.f32.mrf.mxu0  ;;  %v1323_v55 = vand.u32 4294901760, %v1896_v36  ;;  %v1917_v57 = vsub.f32 %v1224_v37, %v1903_v40  ;;  %1259 = vmatpush.msrb.mxu2 %v1875_v7 }
  0x9f   :  { %v1707_v39 = vpop.f32.mrf.mxu1  ;;  %v1734_v63 = vpop.f32.mrf.mxu3  ;;  %v227_v27 = vadd.f32 %v1705_v38, %v203_v13  ;;  %v1082_v38 = vsub.f32 %v1737_v0, %v1081_v31  ;;  %v1089_v0 = vand.u32 4294901760, %v1088_v54  ;;  %v1311_v13 = vand.u32 4294901760, %v1867_v61  ;;  %1302 = vmatpush.msrb.mxu3 %v1301_v9 }
  0xa0   :  { %v1751_v5 = vpop.f32.mrf.mxu2  ;;  %v1317_v31 = vand.u32 4294901760, %v1882_v17  ;;  %v1324_v2 = vsub.f32 %v1896_v36, %v1323_v55 }
  0xa1   :  { %v249_v42 = vadd.f32 %v1707_v39, %v227_v27  ;;  %v1083_v39 = vand.u32 4294901760, %v1082_v38  ;;  %v1889_v27 = vand.u32 4294901760, %v1225_v22  ;;  %v1312_v30 = vsub.f32 %v1867_v61, %v1311_v13  ;;  %1308 = vmatpush.msrb.mxu3 %v1307_v29 }
  0xa2   :  { %v1101_v38 = vand.u32 4294901760, %v1100_v23  ;;  %v1318_v54 = vsub.f32 %v1882_v17, %v1317_v31  ;;  %v1325_v9 = vand.u32 4294901760, %v1324_v2 }
  0xa3   :  { %1084 = vmatpush.msra.mxu1 %v1083_v39  ;;  %v283_v21 = vadd.f32 %v1720_v48, %v249_v42  ;;  %v1906_v41 = vsub.f32 %v1225_v22, %v1889_v27  ;;  %v1313_v53 = vand.u32 4294901760, %v1312_v30  ;;  %1261 = vmatpush.msrb.mxu2 %v1889_v27 }
  0xa5   :  { %1090 = vmatpush.msra.mxu1 %v1089_v0  ;;  %v1329_v42 = vand.u32 4294901760, %v1906_v41  ;;  %1314 = vmatpush.msrb.mxu3 %v1313_v53  ;;  %v1319_v0 = vand.u32 4294901760, %v1318_v54  ;;  %v309_v3 = vadd.f32 %v1717_v45, %v283_v21 }
  0xa6   :  { %v1722_v49 = vpop.f32.mrf.mxu0  ;;  %1263 = vmatpush.msrb.mxu2 %v1903_v40 }
  0xa7   :  { %v1724_v52 = vpop.f32.mrf.mxu1  ;;  %v1824_v33 = vpop.f32.mrf.mxu3  ;;  %1096 = vmatpush.msra.mxu1 %v1095_v15  ;;  %1320 = vmatpush.msrb.mxu3 %v1319_v0  ;;  %v333_v23 = vadd.f32 %v1722_v49, %v309_v3 }
  0xa8   :  { %v1842_v43 = vpop.f32.mrf.mxu2 }
  0xa9   :  { %1102 = vmatpush.msra.mxu1 %v1101_v38  ;;  %1326 = vmatpush.msrb.mxu3 %v1325_v9  ;;  %v357_v37 = vadd.f32 %v1724_v52, %v333_v23  ;;  %v1223_v52 = vld [vmem:[%s2014_s5] sm:$0xff] }
  0xab   :  { %1211 = vmatpush.msrb.mxu1 %v1729_v60  ;;  %v381_v49 = vadd.f32 %v1751_v5, %v357_v37 }
  0xad   :  { %1213 = vmatpush.msrb.mxu1 %v1739_v1 }
  0xae   :  { %v1753_v6 = vpop.f32.mrf.mxu0 }
  0xaf   :  { %v1774_v14 = vpop.f32.mrf.mxu1  ;;  %1215 = vmatpush.msrb.mxu1 %v1759_v8 }
  0xb0   :  { %v462_v48 = vadd.f32 %v1774_v14, %v1753_v6  ;;  %v1330_v6 = vsub.f32 %v1906_v41, %v1329_v42  ;;  %v1335_v14 = vand.u32 4294901760, %v1917_v57 }
  0xb1   :  { %1217 = vmatpush.msrb.mxu1 %v1780_v16 }
  0xb2   :  { %v486_v60 = vadd.f32 %v1842_v43, %v462_v48  ;;  %v1331_v22 = vand.u32 4294901760, %v1330_v6  ;;  %v1336_v45 = vsub.f32 %v1917_v57, %v1335_v14 }
  0xb4   :  { %v1337_v1 = vand.u32 4294901760, %v1336_v45  ;;  %1332 = vmatpush.msrb.mxu3 %v1331_v22  ;;  %v510_v43 = vadd.f32 %v1824_v33, %v486_v60  ;;  %v403_v33 = vadd.f32 %v1734_v63, %v381_v49  ;;  %v1236_v60 = vsel %vm1234_vm13, %v1223_v52, 0 }
  0xb5   :  { %v1264_v22 = vand.u32 4294901760, %v1236_v60 }
  0xb6   :  { %v1844_v44 = vpop.f32.mrf.mxu0  ;;  %1338 = vmatpush.msrb.mxu3 %v1337_v1 }
  0xb7   :  { %v1858_v56 = vpop.f32.mrf.mxu1  ;;  %v534_v38 = vadd.f32 %v1844_v44, %v510_v43 }
  0xb9   :  { %v556_v0 = vadd.f32 %v1858_v56, %v534_v38  ;;  %v1527_v56 = vld [vmem:[%s2020_s11] ss:$0 sm:$0xff] }
  0xbb   :  { %v558_v44 = vadd.f32 %v556_v0, %v403_v33 }
  0xc5   :  { %v639_v39 = vpop.f32.mrf.mxu0 }
  0xc7   :  { %v663_v62 = vpop.f32.mrf.mxu1 }
  0xc9   :  { %v615_v28 = vpop.f32.mrf.mxu3 }
  0xcd   :  { %v744_v30 = vpop.f32.mrf.mxu0 }
  0xcf   :  { %v770_v21 = vpop.f32.mrf.mxu1 }
  0xd0   :  { %v771_v53 = vadd.f32 %v770_v21, %v744_v30 }
  0xd1   :  { %v589_v51 = vpop.f32.mrf.mxu2  ;;  %v709_v15 = vpop.f32.mrf.mxu3 }
  0xd2   :  { %v616_v10 = vadd.f32 %v615_v28, %v589_v51 }
  0xd4   :  { %v640_v28 = vadd.f32 %v639_v39, %v616_v10 }
  0xd5   :  { %v842_v16 = vpop.f32.mrf.mxu0 }
  0xd6   :  { %v664_v8 = vadd.f32 %v663_v62, %v640_v28 }
  0xd7   :  { %v864_v6 = vpop.f32.mrf.mxu1 }
  0xd9   :  { %v687_v29 = vpop.f32.mrf.mxu2  ;;  %v818_v48 = vpop.f32.mrf.mxu3 }
  0xda   :  { %v688_v51 = vadd.f32 %v687_v29, %v664_v8 }
  0xdc   :  { %v710_v39 = vadd.f32 %v709_v15, %v688_v51  ;;  %v1265_v15 = vsub.f32 %v1236_v60, %v1264_v22 }
  0xde   :  { %v712_v62 = vadd.f32 %v710_v39, %v558_v44  ;;  %v1266_v30 = vand.u32 4294901760, %v1265_v15 }
  0xe0   :  { %v1267_v37 = vsub.f32 %v1265_v15, %v1266_v30 }
  0xe1   :  { %v794_v54 = vpop.f32.mrf.mxu2 }
  0xe2   :  { %v795_v2 = vadd.f32 %v794_v54, %v771_v53  ;;  %v1528_v54 = vld [vmem:[%s2024_s15] ss:$0 sm:$0xff] }
  0xe4   :  { %v819_v3 = vadd.f32 %v818_v48, %v795_v2 }
  0xe6   :  { %v843_v5 = vadd.f32 %v842_v16, %v819_v3 }
  0xe8   :  { %v865_v9 = vadd.f32 %v864_v6, %v843_v5 }
  0xea   :  { %v867_v10 = vadd.f32 %v865_v9, %v712_v62 }
  0xec   :  { %v872_v63 = vadd.f32 %v1527_v56, %v867_v10 }
  0xee   :  { %v873_v45 = vmax.f32 %v872_v63, 0.0 }
  0xf0   :  { %v1036_v23 = vsel %vm1034_vm14, %v873_v45, 0 }
  0xf1   :  { %v1058_v1 = vand.u32 4294901760, %v1036_v23 }
  0xf3   :  { %1104 = vmatmul.f32.vlgmr.msra.gmra.mxu1 %v1058_v1  ;;  %v1059_v29 = vsub.f32 %v1036_v23, %v1058_v1 }
  0xf4   :  { %1393 = vmatpush.msra.mxu1 %v1749_v4 }
  0xf5   :  { %1134 = vmatmul.f32.vlgmr.msra.gmra.mxu2 %v1059_v29  ;;  %v1060_v43 = vand.u32 4294901760, %v1059_v29 }
  0xf6   :  { %1428 = vmatpush.msra.mxu2 %v1281_v18  ;;  %1395 = vmatpush.msra.mxu1 %v1771_v12  ;;  %v1268_v18 = vand.u32 4294901760, %v1267_v37 }
  0xf7   :  { %1161 = vmatmul.f32.vlgmr.msra.gmra.mxu3 %v1060_v43  ;;  %v1061_v28 = vsub.f32 %v1059_v29, %v1060_v43 }
  0xf8   :  { %1432 = vmatpush.msra.mxu2 %v1287_v24  ;;  %1477 = vmatpush.msra.mxu3 %v1749_v4  ;;  %v911_v4 = vpop.f32.mrf.mxu2  ;;  %v985_v24 = vpop.f32.mrf.mxu1 }
  0xf9   :  { %v1062_v21 = vand.u32 4294901760, %v1061_v28  ;;  %1397 = vmatpush.msra.mxu1 %v1787_v19 }
  0xfa   :  { %1436 = vmatpush.msra.mxu2 %v1293_v32  ;;  %1479 = vmatpush.msra.mxu3 %v1771_v12 }
  0xfb   :  { %1063 = vmatmul.f32.vlgmr.msra.gmra.mxu0 %v1062_v21  ;;  %1219 = vmatmul.f32.vlgmr.msrb.gmra.mxu1 %v1058_v1 }
  0xfc   :  { %1352 = vmatpush.msra.mxu0 %v1769_v11  ;;  %1440 = vmatpush.msra.mxu2 %v1299_v46  ;;  %v937_v11 = vpop.f32.mrf.mxu3 }
  0xfd   :  { %1481 = vmatpush.msra.mxu3 %v1787_v19  ;;  %1399 = vmatpush.msra.mxu1 %v1806_v25  ;;  %v938_v12 = vadd.f32 %v937_v11, %v911_v4  ;;  %v961_v19 = vpop.f32.mrf.mxu0 }
  0xfe   :  { %1355 = vmatpush.msra.mxu0 %v1790_v20  ;;  %1444 = vmatpush.msra.mxu2 %v1305_v58 }
  0xff   :  { %1483 = vmatpush.msra.mxu3 %v1806_v25  ;;  %1269 = vmatmul.f32.vlgmr.msrb.gmra.mxu2 %v1268_v18  ;;  %v962_v20 = vadd.f32 %v961_v19, %v938_v12 }
 0x100   :  { %1358 = vmatpush.msra.mxu0 %v1809_v26  ;;  %1448 = vmatpush.msra.mxu2 %v1311_v13  ;;  %v1009_v25 = vpop.f32.mrf.mxu2 }
 0x101   :  { %1485 = vmatpush.msra.mxu3 %v1827_v34  ;;  %1401 = vmatpush.msra.mxu1 %v1827_v34  ;;  %v986_v26 = vadd.f32 %v985_v24, %v962_v20 }
 0x102   :  { %1361 = vmatpush.msra.mxu0 %v1830_v35  ;;  %1340 = vmatmul.f32.vlgmr.msrb.gmra.mxu3 %v1264_v22 }
 0x103   :  { %1194 = vmatmul.f32.vlgmr.msrb.gmra.mxu0 %v1058_v1  ;;  %1452 = vmatpush.msra.mxu2 %v1317_v31  ;;  %v1010_v34 = vadd.f32 %v1009_v25, %v986_v26 }
 0x104   :  { %1364 = vmatpush.msra.mxu0 %v1850_v50  ;;  %1487 = vmatpush.msra.mxu3 %v1847_v47  ;;  %v1031_v32 = vpop.f32.mrf.mxu3 }
 0x105   :  { %1403 = vmatpush.msra.mxu1 %v1847_v47  ;;  %1456 = vmatpush.msra.mxu2 %v1323_v55  ;;  %v1032_v50 = vadd.f32 %v1031_v32, %v1010_v34 }
 0x106   :  { %1367 = vmatpush.msra.mxu0 %v1867_v61  ;;  %1489 = vmatpush.msra.mxu3 %v1864_v59 }
 0x107   :  { %1405 = vmatpush.msra.mxu1 %v1864_v59  ;;  %1460 = vmatpush.msra.mxu2 %v1329_v42 }
 0x108   :  { %1370 = vmatpush.msra.mxu0 %v1882_v17  ;;  %1491 = vmatpush.msra.mxu3 %v1875_v7 }
 0x109   :  { %1407 = vmatpush.msra.mxu1 %v1875_v7  ;;  %1464 = vmatpush.msra.mxu2 %v1335_v14 }
 0x10a   :  { %1373 = vmatpush.msra.mxu0 %v1896_v36  ;;  %1493 = vmatpush.msra.mxu3 %v1889_v27 }
 0x10b   :  { %1466 = vmatmul.f32.vlgmr.msra.gmra.mxu2 %v1264_v22  ;;  %1409 = vmatpush.msra.mxu1 %v1889_v27 }
 0x10c   :  { %1376 = vmatpush.msra.mxu0 %v1906_v41  ;;  %1495 = vmatpush.msra.mxu3 %v1903_v40 }
 0x10d   :  { %1497 = vmatmul.f32.vlgmr.msra.gmra.mxu3 %v1264_v22  ;;  %1411 = vmatpush.msra.mxu1 %v1903_v40 }
 0x10e   :  { %1379 = vmatpush.msra.mxu0 %v1917_v57  ;;  %1415 = vmatmul.f32.vlgmr.msra.gmra.mxu1 %v1266_v30 }
 0x10f   :  { %1382 = vmatmul.f32.vlgmr.msra.gmra.mxu0 %v1265_v15 }
 0x170   :  { %v1105_v35 = vpop.f32.mrf.mxu1 }
 0x178   :  { %v1064_v46 = vpop.f32.mrf.mxu0  ;;  %v1135_v47 = vpop.f32.mrf.mxu2 }
 0x179   :  { %v1065_v58 = vadd.f32 %v1064_v46, %v1032_v50  ;;  %v1220_v7 = vpop.f32.mrf.mxu1 }
 0x17a   :  { %v1162_v59 = vpop.f32.mrf.mxu3 }
 0x17b   :  { %v1106_v61 = vadd.f32 %v1105_v35, %v1065_v58 }
 0x17d   :  { %v1136_v27 = vadd.f32 %v1135_v47, %v1106_v61 }
 0x17f   :  { %v1163_v36 = vadd.f32 %v1162_v59, %v1136_v27 }
 0x180   :  { %v1195_v13 = vpop.f32.mrf.mxu0 }
 0x181   :  { %v1196_v14 = vadd.f32 %v1195_v13, %v1163_v36 }
 0x182   :  { %v1270_v17 = vpop.f32.mrf.mxu2 }
 0x183   :  { %v1221_v51 = vadd.f32 %v1220_v7, %v1196_v14 }
 0x185   :  { %v1341_v31 = vpop.f32.mrf.mxu3 }
 0x186   :  { %v1342_v40 = vadd.f32 %v1341_v31, %v1270_v17 }
 0x18b   :  { %v1416_v55 = vpop.f32.mrf.mxu1 }
 0x18c   :  { %v1383_v41 = vpop.f32.mrf.mxu0 }
 0x18d   :  { %v1384_v42 = vadd.f32 %v1383_v41, %v1342_v40 }
 0x18e   :  { %v1467_v57 = vpop.f32.mrf.mxu2 }
 0x18f   :  { %v1417_v38 = vadd.f32 %v1416_v55, %v1384_v42 }
 0x190   :  { %v1498_v8 = vpop.f32.mrf.mxu3 }
 0x191   :  { %v1468_v49 = vadd.f32 %v1467_v57, %v1417_v38 }
 0x193   :  { %v1499_v53 = vadd.f32 %v1498_v8, %v1468_v49 }
 0x195   :  { %v1501_v48 = vadd.f32 %v1499_v53, %v1221_v51 }
 0x197   :  { %v1506_v0 = vadd.f32 %v1528_v54, %v1501_v48 }
 0x199   :  { %v1507_v2 = vmax.f32 %v1506_v0, 0.0 }
 0x19b   :  { %1508 = vst.msk [vmem:[#allocation2] sm:$0xff] %vm1034_vm14, %v1507_v2 }
 0x19c   :  { %1519 = dma.vmem_to_hbm [thread:$0]  %s1515_s25, 128, %s1517_s28, [#allocation3]  }
 0x19d   :  { %1559 = dma.done.wait [#allocation3], 128  }
 0x19e   :  { %1560 = vsyncadd [#allocation3], 4294967168 }
 0x19f   :  { %1524 = vsyncpa [#allocation3], 1 }

</bundles_post_ra>
